<compile_context>
chip_gen: v6e
topology: v6e:2x2x1
jax: 0.10.0
libtpu: 0.0.40
codegen_flags: <defaults>
</compile_context>

<pallas_src>
import jax
import jax.numpy as jnp
from jax.experimental import pallas as pl
from jax.experimental.pallas import tpu as pltpu


NEG_LARGE = -1e30    # "minus infinity" for padded action lanes (f32 only; exp underflows to 0)
ACTION_PAD = 128     # lane-dense padded action dim used for the MXU matmul + softmax
OUT_PAD = 8          # compact output width actually written back to HBM (>= n_action)
BLOCK_M = 256        # max rows per grid step (multiple of 8; working set stays tiny)


def actor_kernel(x_ref, w1b1_ref, w2b2_ref, out_ref):
    # x_ref:    (block_m, n_state)
    # w1b1_ref: (n_state + 1, hidden)    rows 0..n_state-1 = W1^T, last row = b1
    # w2b2_ref: (hidden + 1, ACTION_PAD) rows 0..hidden-1 = W2^T (zero in padded lanes),
    #                                    last row = b2 (NEG_LARGE in padded lanes)
    # out_ref:  (block_m, OUT_PAD)       lanes >= n_action are exactly 0 after softmax
    x = x_ref[...]
    w1b1 = w1b1_ref[...]
    w2b2 = w2b2_ref[...]

    n_state = w1b1.shape[0] - 1
    hidden = w2b2.shape[0] - 1

    # ---- fc1 (+bias) as VPU broadcast-mul-accumulate, 2 independent partial sums ----
    acc0 = x[:, 0:1] * w1b1[0:1, :]
    acc1 = x[:, 1:2] * w1b1[1:2, :] if n_state >= 2 else None
    for k in range(2, n_state):
        if k % 2 == 0:
            acc0 = acc0 + x[:, k:k + 1] * w1b1[k:k + 1, :]
        else:
            acc1 = acc1 + x[:, k:k + 1] * w1b1[k:k + 1, :]
    h = acc0 + w1b1[n_state:n_state + 1, :]          # + b1
    if acc1 is not None:
        h = h + acc1
    h = jnp.maximum(h, 0.0)                          # ReLU, (block_m, hidden)

    # ---- fc2 on the MXU; last slab row is the (padded) bias ----
    logits = jnp.dot(h, w2b2[:hidden, :], preferred_element_type=jnp.float32)
    logits = logits + w2b2[hidden:hidden + 1, :]     # padded lanes -> NEG_LARGE

    # ---- softmax over the action (lane) axis == PyTorch Softmax(dim=0) per state ----
    m = jnp.max(logits, axis=-1, keepdims=True)
    e = jnp.exp(logits - m)                          # padded lanes -> exp(-1e30) = 0
    s = jnp.sum(e, axis=-1, keepdims=True)
    inv = pl.reciprocal(s, approx=True)              # EUP slot
    inv = inv * (2.0 - s * inv)                      # one Newton step: full f32 accuracy
    probs = e * inv

    # Compact store: only the first OUT_PAD lanes go back to HBM (16x less writeback).
    out_ref[...] = probs[:, :out_ref.shape[1]]


def pack_params(w1, b1, w2, b2, action_pad=ACTION_PAD):
    """Pack (W1,b1,W2,b2) into two slabs; pad actions to a lane-dense width for the MXU.
    Done once outside the kernel; reuse across every forward call."""
    n_state, hidden = w1.shape
    n_action = w2.shape[1]
    w1b1 = jnp.concatenate(
        [w1.astype(jnp.float32), b1.reshape(1, hidden).astype(jnp.float32)], axis=0
    )                                                                  # (n_state+1, hidden)
    w2_pad = jnp.zeros((hidden, action_pad), jnp.float32).at[:, :n_action].set(w2)
    b2_pad = jnp.full((1, action_pad), NEG_LARGE, jnp.float32).at[0, :n_action].set(b2)
    w2b2 = jnp.concatenate([w2_pad, b2_pad], axis=0)                   # (hidden+1, action_pad)
    return w1b1, w2b2


def _dimension_semantics():
    """CORE_PARALLEL only buys anything on multi-TensorCore chips (v7x); 'parallel' elsewhere."""
    try:
        kind = jax.devices()[0].device_kind.lower()
    except Exception:
        kind = ""
    if "v7" in kind:
        return (pltpu.CORE_PARALLEL,)
    return ("parallel",)


def actor_forward(x, w1b1, w2b2, n_action, block_rows=BLOCK_M):
    """x: (M, n_state) batch of states (or a single (n_state,) state).
    Returns per-state action probabilities: (M, n_action) (or (n_action,))."""
    squeeze = (x.ndim == 1)
    if squeeze:
        x = x.reshape(1, -1)
    x = x.astype(jnp.float32)

    m_rows, n_state = x.shape
    assert n_state == w1b1.shape[0] - 1
    assert n_action <= OUT_PAD <= w2b2.shape[1]

    # Adaptive row block: one step for small batches, big (overhead-amortizing) blocks
    # for rollout-sized batches.  Always a multiple of 8 (f32 sublane tile).
    block_m = min(block_rows, pl.cdiv(m_rows, 8) * 8)
    m_pad = pl.cdiv(m_rows, block_m) * block_m
    if m_pad != m_rows:
        x = jnp.pad(x, ((0, m_pad - m_rows), (0, 0)))   # padded rows sliced off below

    grid = (m_pad // block_m,)
    out = pl.pallas_call(
        actor_kernel,
        out_shape=jax.ShapeDtypeStruct((m_pad, OUT_PAD), jnp.float32),
        grid=grid,
        in_specs=[
            pl.BlockSpec((block_m, n_state), lambda i: (i, 0)),   # per-row-block states
            pl.BlockSpec(w1b1.shape, lambda i: (0, 0)),           # params: same block every
            pl.BlockSpec(w2b2.shape, lambda i: (0, 0)),           #   step -> fetched once
        ],
        out_specs=pl.BlockSpec((block_m, OUT_PAD), lambda i: (i, 0)),
        compiler_params=pltpu.CompilerParams(
            dimension_semantics=_dimension_semantics(),
            vmem_limit_bytes=32 * 1024 * 1024,        # explicit headroom; safe on v7x 64 MiB
        ),
    )(x, w1b1, w2b2)

    probs = out[:m_rows, :n_action]
    if squeeze:
        probs = probs.reshape(n_action)
    return probs


def init_params(key, n_state, hidden, n_action):
    """Deterministic init, PyTorch-Linear-style uniform(-1/sqrt(fan_in), 1/sqrt(fan_in))."""
    k1, k2, k3, k4 = jax.random.split(key, 4)
    bound1 = 1.0 / jnp.sqrt(jnp.float32(n_state))
    bound2 = 1.0 / jnp.sqrt(jnp.float32(hidden))
    # Stored already transposed w.r.t. PyTorch: (in, out)
    w1 = jax.random.uniform(k1, (n_state, hidden), jnp.float32, -bound1, bound1)
    b1 = jax.random.uniform(k2, (hidden,), jnp.float32, -bound1, bound1)
    w2 = jax.random.uniform(k3, (hidden, n_action), jnp.float32, -bound2, bound2)
    b2 = jax.random.uniform(k4, (n_action,), jnp.float32, -bound2, bound2)
    return w1, b1, w2, b2


if __name__ == "__main__":
    # CartPole-like sizes implied by the module: n_state=4, n_action=2, hidden=32.
    n_state, hidden, n_action = 4, 32, 2

    key = jax.random.PRNGKey(0)
    kx, kb, kp = jax.random.split(key, 3)
    w1, b1, w2, b2 = init_params(kp, n_state, hidden, n_action)

    # Pack parameters once (kept/reused across calls in a real RL loop).
    w1b1, w2b2 = pack_params(w1, b1, w2, b2)

    def reference(x2d):
        h_ref = jnp.maximum(x2d @ w1 + b1, 0.0)
        return jax.nn.softmax(h_ref @ w2 + b2, axis=-1)

    # --- small batch (single small grid step) ---
    M_small = 8
    xb = jax.random.normal(kx, (M_small, n_state), jnp.float32)
    probs = jax.block_until_ready(actor_forward(xb, w1b1, w2b2, n_action))
    probs_ref = reference(xb)
    assert probs.shape == (M_small, n_action), probs.shape
    assert jnp.allclose(probs, probs_ref, atol=1e-4), (probs, probs_ref)
    assert jnp.allclose(jnp.sum(probs, axis=-1), 1.0, atol=1e-4)

    # --- rollout-sized batch (exercises BLOCK_M=256 blocks, grid > 1, row padding) ---
    M_big = 300
    xg = jax.random.normal(kb, (M_big, n_state), jnp.float32)
    probs_big = jax.block_until_ready(actor_forward(xg, w1b1, w2b2, n_action))
    probs_big_ref = reference(xg)
    assert probs_big.shape == (M_big, n_action), probs_big.shape
    assert jnp.allclose(probs_big, probs_big_ref, atol=1e-4)
    assert jnp.allclose(jnp.sum(probs_big, axis=-1), 1.0, atol=1e-4)

    # --- single-state path: exactly the PyTorch module's forward (Softmax(dim=0) on 1-D logits) ---
    p0 = jax.block_until_ready(actor_forward(xb[0], w1b1, w2b2, n_action))
    assert p0.shape == (n_action,), p0.shape
    assert jnp.allclose(p0, probs_ref[0], atol=1e-4), (p0, probs_ref[0])

    print("KERNEL_OK")
</pallas_src>

<mosaic_0001>
module attributes {stable_mosaic.version = 11 : i64} {
  func.func @actor_kernel(%arg0: i32, %arg1: memref<8x4xf32, #tpu.memory_space<vmem>>, %arg2: memref<5x32xf32, #tpu.memory_space<vmem>>, %arg3: memref<33x128xf32, #tpu.memory_space<vmem>>, %arg4: memref<8x8xf32, #tpu.memory_space<vmem>>) attributes {dimension_semantics = [#tpu.dimension_semantics<parallel>], iteration_bounds = array<i64: 1>, scalar_prefetch = 0 : i64, scratch_operands = 0 : i64, tpu.core_type = #tpu.core_type<tc>, window_params = [{transform_indices = @transform_0, window_bounds = array<i64: 8, 4>}, {pipeline_mode = #tpu.pipeline_mode<synchronous>, transform_indices = @transform_1, window_bounds = array<i64: 5, 32>}, {pipeline_mode = #tpu.pipeline_mode<synchronous>, transform_indices = @transform_2, window_bounds = array<i64: 33, 128>}, {transform_indices = @transform_3, window_bounds = array<i64: 8, 8>}]} {
    %c0 = arith.constant 0 : index
    %c0_0 = arith.constant 0 : index
    %0 = vector.load %arg1[%c0, %c0_0] : memref<8x4xf32, #tpu.memory_space<vmem>>, vector<8x4xf32>
    %c0_1 = arith.constant 0 : index
    %c0_2 = arith.constant 0 : index
    %1 = vector.load %arg2[%c0_1, %c0_2] : memref<5x32xf32, #tpu.memory_space<vmem>>, vector<5x32xf32>
    %c0_3 = arith.constant 0 : index
    %c0_4 = arith.constant 0 : index
    %2 = vector.load %arg3[%c0_3, %c0_4] : memref<33x128xf32, #tpu.memory_space<vmem>>, vector<33x128xf32>
    %3 = vector.extract_strided_slice %0 {offsets = [0, 0], sizes = [8, 1], strides = [1, 1]} : vector<8x4xf32> to vector<8x1xf32>
    %4 = vector.extract_strided_slice %1 {offsets = [0, 0], sizes = [1, 32], strides = [1, 1]} : vector<5x32xf32> to vector<1x32xf32>
    %5 = vector.broadcast %3 : vector<8x1xf32> to vector<8x32xf32>
    %6 = vector.broadcast %4 : vector<1x32xf32> to vector<8x32xf32>
    %7 = arith.mulf %5, %6 : vector<8x32xf32>
    %8 = vector.extract_strided_slice %0 {offsets = [0, 1], sizes = [8, 1], strides = [1, 1]} : vector<8x4xf32> to vector<8x1xf32>
    %9 = vector.extract_strided_slice %1 {offsets = [1, 0], sizes = [1, 32], strides = [1, 1]} : vector<5x32xf32> to vector<1x32xf32>
    %10 = vector.broadcast %8 : vector<8x1xf32> to vector<8x32xf32>
    %11 = vector.broadcast %9 : vector<1x32xf32> to vector<8x32xf32>
    %12 = arith.mulf %10, %11 : vector<8x32xf32>
    %13 = vector.extract_strided_slice %0 {offsets = [0, 2], sizes = [8, 1], strides = [1, 1]} : vector<8x4xf32> to vector<8x1xf32>
    %14 = vector.extract_strided_slice %1 {offsets = [2, 0], sizes = [1, 32], strides = [1, 1]} : vector<5x32xf32> to vector<1x32xf32>
    %15 = vector.broadcast %13 : vector<8x1xf32> to vector<8x32xf32>
    %16 = vector.broadcast %14 : vector<1x32xf32> to vector<8x32xf32>
    %17 = arith.mulf %15, %16 : vector<8x32xf32>
    %18 = arith.addf %7, %17 : vector<8x32xf32>
    %19 = vector.extract_strided_slice %0 {offsets = [0, 3], sizes = [8, 1], strides = [1, 1]} : vector<8x4xf32> to vector<8x1xf32>
    %20 = vector.extract_strided_slice %1 {offsets = [3, 0], sizes = [1, 32], strides = [1, 1]} : vector<5x32xf32> to vector<1x32xf32>
    %21 = vector.broadcast %19 : vector<8x1xf32> to vector<8x32xf32>
    %22 = vector.broadcast %20 : vector<1x32xf32> to vector<8x32xf32>
    %23 = arith.mulf %21, %22 : vector<8x32xf32>
    %24 = arith.addf %12, %23 : vector<8x32xf32>
    %25 = vector.extract_strided_slice %1 {offsets = [4, 0], sizes = [1, 32], strides = [1, 1]} : vector<5x32xf32> to vector<1x32xf32>
    %26 = vector.broadcast %25 : vector<1x32xf32> to vector<8x32xf32>
    %27 = arith.addf %18, %26 : vector<8x32xf32>
    %28 = arith.addf %27, %24 : vector<8x32xf32>
    %cst = arith.constant 0.000000e+00 : f32
    %29 = vector.broadcast %cst : f32 to vector<8x32xf32>
    %30 = arith.maximumf %28, %29 : vector<8x32xf32>
    %31 = vector.extract_strided_slice %2 {offsets = [0, 0], sizes = [32, 128], strides = [1, 1]} : vector<33x128xf32> to vector<32x128xf32>
    %cst_5 = arith.constant dense<0.000000e+00> : vector<8x128xf32>
    %32 = tpu.matmul %30, %31, %cst_5 {dimension_numbers = #tpu.dot_dimension_numbers<[1], [0], [0], [1], [0, 0, 1, 1], [], []>} : vector<8x32xf32>, vector<32x128xf32>, vector<8x128xf32> -> vector<8x128xf32>
    %33 = vector.extract_strided_slice %2 {offsets = [32, 0], sizes = [1, 128], strides = [1, 1]} : vector<33x128xf32> to vector<1x128xf32>
    %34 = vector.broadcast %33 : vector<1x128xf32> to vector<8x128xf32>
    %35 = arith.addf %32, %34 : vector<8x128xf32>
    %cst_6 = arith.constant dense<0xFF800000> : vector<8xf32>
    %36 = vector.multi_reduction <maximumf>, %35, %cst_6 [1] : vector<8x128xf32> to vector<8xf32>
    %37 = vector.shape_cast %36 : vector<8xf32> to vector<8x1xf32>
    %38 = vector.broadcast %37 : vector<8x1xf32> to vector<8x128xf32>
    %39 = arith.subf %35, %38 : vector<8x128xf32>
    %40 = math.exp %39 : vector<8x128xf32>
    %cst_7 = arith.constant dense<0.000000e+00> : vector<8xf32>
    %41 = vector.multi_reduction <add>, %40, %cst_7 [1] : vector<8x128xf32> to vector<8xf32>
    %42 = vector.shape_cast %41 : vector<8xf32> to vector<8x1xf32>
    %43 = tpu.reciprocal %42 {approx = true} : vector<8x1xf32> -> vector<8x1xf32>
    %44 = arith.mulf %42, %43 : vector<8x1xf32>
    %cst_8 = arith.constant 2.000000e+00 : f32
    %45 = vector.broadcast %cst_8 : f32 to vector<8x1xf32>
    %46 = arith.subf %45, %44 : vector<8x1xf32>
    %47 = arith.mulf %43, %46 : vector<8x1xf32>
    %48 = vector.broadcast %47 : vector<8x1xf32> to vector<8x128xf32>
    %49 = arith.mulf %40, %48 : vector<8x128xf32>
    %50 = vector.extract_strided_slice %49 {offsets = [0, 0], sizes = [8, 8], strides = [1, 1]} : vector<8x128xf32> to vector<8x8xf32>
    %c0_9 = arith.constant 0 : index
    %c0_10 = arith.constant 0 : index
    %51 = vector.load %arg4[%c0_9, %c0_10] : memref<8x8xf32, #tpu.memory_space<vmem>>, vector<8x8xf32>
    tpu.vector_store %arg4[%c0_9, %c0_10], %50 {strides = array<i32>} : memref<8x8xf32, #tpu.memory_space<vmem>>, vector<8x8xf32>,
    return
  }
  func.func @transform_0(%arg0: i32) -> (i32, i32) {
    %c0_i32 = arith.constant 0 : i32
    %c0_i32_0 = arith.constant 0 : i32
    return %arg0, %c0_i32 : i32, i32
  }
  func.func @transform_1(%arg0: i32) -> (i32, i32) {
    %c0_i32 = arith.constant 0 : i32
    %c0_i32_0 = arith.constant 0 : i32
    %c0_i32_1 = arith.constant 0 : i32
    return %c0_i32, %c0_i32_0 : i32, i32
  }
  func.func @transform_2(%arg0: i32) -> (i32, i32) {
    %c0_i32 = arith.constant 0 : i32
    %c0_i32_0 = arith.constant 0 : i32
    %c0_i32_1 = arith.constant 0 : i32
    return %c0_i32, %c0_i32_0 : i32, i32
  }
  func.func @transform_3(%arg0: i32) -> (i32, i32) {
    %c0_i32 = arith.constant 0 : i32
    %c0_i32_0 = arith.constant 0 : i32
    return %arg0, %c0_i32 : i32, i32
  }
}

</mosaic_0001>

<bundles_post_ra>
// kernel: tpu_custom_call.1
= control target key start
LH: loop header
LB: loop body
LE: loop exit
PB: predicated region body
PF: predicated region fallthrough
CT: control target
= control target key end

     0   :  { %8 = vsyncpa [#allocation3], 0  ;;  %s312_s0 = inlined_call_operand.vmem [shape: f32[8,4], index: 0, kind: input, shape index: {}]   ;;  %s313_s1 = inlined_call_operand.vmem [shape: f32[5,32], index: 1, kind: input, shape index: {}]   ;;  %s314_s2 = inlined_call_operand.hbm [shape: f32[33,128], index: 2, kind: input, shape index: {}]   ;;  %s315_s3 = inlined_call_operand.hbm [shape: f32[8,8], index: 3, kind: output, shape index: {}]  }
   0x1   :  { %9 = vsyncpa [#allocation4], 0  ;;  %s270_s12 = smov [#allocation2]  }
   0x2   :  { %s19_s13 = sshll.u32 %s270_s12, 4  ;;  %s20_s13 = int_to_ptr.vmem [resolvable:$true] %s19_s13 }
   0x3   :  { %s234_s14 = scalar_lea.vmem %s20_s13, 640  ;;  %p239_p1 = scmp.lt.s32.totalorder %s20_s13, %s20_s13 }
   0x4   :  { %p235_p0 = scmp.ne.s32.totalorder %s20_s13, %s234_s14  ;;  %p240_p2 = scmp.lt.s32.totalorder %s234_s14, %s234_s14 }
   0x6   :  { %p241_p3 = por %p240_p2, %p239_p1 }
   0x8   :  { %p242_p4 = pnand %p241_p3, %p235_p0 }
   0xa   :  { %245 = shalt.err (!%p242_p4)
}
   0xb   :  { %s271_s15 = smov 128   ;;  %s272_s16 = smov 8  }
   0xc   :  { %25 = dma.hbm_to_vmem [thread:$0]  %s314_s2, 640, %s20_s13, [#allocation3], %s271_s15, %s271_s15, %s272_s16  }
   0xd   :  { %266 = dma.done.wait [#allocation3], 640  }
   0xe   :  { %267 = vsyncadd [#allocation3], 4294966656  ;;  %v273_v0 = vmov 1   ;;  %v274_v1 = vmov 0   ;;  %v29_v2 = vld [vmem:[%s312_s0] sm:$0xff]  ;;  %v275_v3 = vmov 0.0   ;;  %v41_v10 = vlaneseq }
   0xf   :  { %219 = vset.pattern.permute.xlu1 %v273_v0  ;;  %217 = vset.pattern.permute.xlu0 %v274_v1  ;;  %v34_v4 = vld [vmem:[#allocation2 + $0x18] sm:$0xff]  ;;  %v276_v5 = vmov 3   ;;  %v277_v6 = vmov 2   ;;  %v33_v7 = vld [vmem:[#allocation2 + $0x10] sm:$0xff]  ;;  %v32_v8 = vld [vmem:[#allocation2 + $0x8] sm:$0xff]  ;;  %vm278_vm0 = vmmov 0  }
  0x10   :  { %47 = vperm.xlu1 %219, %v29_v2   ;;  %38 = vperm.xlu0 %217, %v29_v2   ;;  %v31_v9 = vld [vmem:[#allocation2] sm:$0xff]  ;;  %v42_v11 = vshrl.u32 %v41_v10, 7  ;;  %vm86_vm1 = vcmask 261120   ;;  %vm172_vm2 = vcmask 64512  }
  0x11   :  { %196 = vmatprep.subr.mxu0 %v275_v3  ;;  %204 = vmatprep.mubr.msk.f32.mxu0 %vm278_vm0, %v275_v3  ;;  %v30_v15 = vld [vmem:[%s313_s1] sm:$0x1f]  ;;  %s279_s1 = smov [#allocation5]  }
  0x12   :  { %197 = vmatpush3.msra.mxu0 %v34_v4  ;;  %v43_v12 = vsub.s32 0, %v42_v11  ;;  %v71_v13 = vsub.s32 3, %v42_v11  ;;  %v61_v14 = vsub.s32 2, %v42_v11  ;;  %v52_v17 = vsub.s32 1, %v42_v11  ;;  %v189_v36 = vld [vmem:[#allocation2 + $0x20] ss:$0 sm:$0xff] }
  0x13   :  { %198 = vmatprep.subr.mxu0 %v275_v3  ;;  %v77_v22 = vsub.s32 4, %v42_v11  ;;  %s180_s21 = sshll.u32 %s279_s1, 4  ;;  %s181_s21 = int_to_ptr.vmem [resolvable:$true] %s180_s21 }
  0x14   :  { %220 = vset.pattern.permute.xlu1 %v276_v5  ;;  %218 = vset.pattern.permute.xlu0 %v277_v6  ;;  %v44_v19 = vrot.slane %v30_v15, %v43_v12  ;;  %v72_v20 = vrot.slane %v30_v15, %v71_v13  ;;  %v62_v21 = vrot.slane %v30_v15, %v61_v14  ;;  %s246_s22 = scalar_lea.vmem %s181_s21, 128  ;;  %p251_p6 = scmp.lt.s32.totalorder %s181_s21, %s181_s21 }
  0x15   :  { %66 = vperm.xlu1 %220, %v29_v2   ;;  %56 = vperm.xlu0 %218, %v29_v2   ;;  %v53_v23 = vrot.slane %v30_v15, %v52_v17  ;;  %v78_v28 = vrot.slane %v30_v15, %v77_v22  ;;  %p247_p5 = scmp.ne.s32.totalorder %s181_s21, %s246_s22  ;;  %p252_p7 = scmp.lt.s32.totalorder %s246_s22, %s246_s22 }
  0x16   :  { %199 = vmatpush3.msra.mxu0 %v33_v7 }
  0x17   :  { %200 = vmatprep.subr.mxu0 %v275_v3  ;;  %p253_p8 = por %p252_p7, %p251_p6 }
  0x18   :  { %201 = vmatpush3.msra.mxu0 %v32_v8 }
  0x19   :  { %221 = vset.pattern.permute.xlu0 %v276_v5  ;;  %202 = vmatprep.subr.mxu0 %v275_v3  ;;  %p254_p9 = pnand %p253_p8, %p247_p5 }
  0x1a   :  { %203 = vmatpush3.msra.mxu0 %v31_v9 }
  0x8b   :  { %v39_v16 = vpop.permute.xlu0 %38  ;;  %v48_v18 = vpop.permute.xlu1 %47 }
  0x8c   :  { %v45_v26 = vmul.f32 %v44_v19, %v39_v16  ;;  %v54_v30 = vmul.f32 %v53_v23, %v48_v18 }
  0x90   :  { %v67_v24 = vpop.permute.xlu1 %66  ;;  %v57_v25 = vpop.permute.xlu0 %56 }
  0x91   :  { %v73_v27 = vmul.f32 %v72_v20, %v67_v24  ;;  %v63_v29 = vmul.f32 %v62_v21, %v57_v25 }
  0x93   :  { %v64_v31 = vadd.f32 %v63_v29, %v45_v26  ;;  %v74_v32 = vadd.f32 %v73_v27, %v54_v30 }
  0x95   :  { %v79_v33 = vadd.f32 %v78_v28, %v64_v31 }
  0x97   :  { %v80_v34 = vadd.f32 %v79_v33, %v74_v32 }
  0x99   :  { %v81_v35 = vmax.f32 %v80_v34, 0.0 }
  0x9b   :  { %205 = vmatmul.mubr.msk.f32.vlgmr.msra.gmra.mxu0 %vm86_vm1, %v81_v35 }
 0x15b   :  { %v156_v37 = vpop.f32.mrf.mxu0 }
 0x15c   :  { %v157_v38 = vadd.f32 %v189_v36, %v156_v37 }
 0x15d   :  { %v206_v39 = vpop.f32.mrf.mxu0 }
 0x15e   :  { %160 = vmax.xlane.f32.xlu1 %v157_v38 }
 0x1e7   :  { %v161_v40 = vpop.xlane.xlu1 %160 }
 0x1e8   :  { %v162_v41 = vsub.f32 %v157_v38, %v161_v40 }
 0x1ea   :  { %v163_v42 = vmul.f32 1.442695, %v162_v41 }
 0x1ec   :  { %222 = vpow2.f32 %v163_v42 }
 0x1f9   :  { %v223_v43 = vpop.eup %222 }
 0x1fa   :  { %165 = vadd.xlane.f32.xlu0 %v223_v43 }
 0x283   :  { %v166_v44 = vpop.xlane.xlu0 %165 }
 0x284   :  { %224 = vrcp.f32 %v166_v44 }
 0x291   :  { %v225_v45 = vpop.eup %224 }
 0x292   :  { %v168_v46 = vmul.f32 %v225_v45, %v166_v44 }
 0x294   :  { %v169_v47 = vsub.f32 2.0, %v168_v46 }
 0x296   :  { %v170_v48 = vmul.f32 %v225_v45, %v169_v47 }
 0x298   :  { %v171_v49 = vmul.f32 %v223_v43, %v170_v48 }
 0x29a   :  { %173 = vst.msk [vmem:[#allocation5] sm:$0xff] %vm172_vm2, %v171_v49 }
 0x29b   :  { %257 = shalt.err (!%p254_p9)
}
 0x29c   :  { %183 = dma.vmem_to_hbm [thread:$0]  %s181_s21, 128, %s315_s3, [#allocation4]  }
 0x29d   :  { %268 = dma.done.wait [#allocation4], 128  }
 0x29e   :  { %269 = vsyncadd [#allocation4], 4294967168 }
 0x29f   :  { %187 = vsyncpa [#allocation3], 1 }
 0x2a0   :  { %188 = vsyncpa [#allocation4], 1 }

</bundles_post_ra>
